<compile_context>
chip_gen: v5e
topology: v5e:2x2
jax: 0.10.0
libtpu: 0.0.40
codegen_flags: <defaults>
</compile_context>

<pallas_src>
import math

import jax
import jax.numpy as jnp
from jax import lax
from jax.experimental import pallas as pl
from jax.experimental.pallas import tpu as pltpu


def _make_alignment_kernel(temperature: float):
    """Builds the per-block kernel; `temperature` is baked in as a constant."""

    def kernel(x_ref, y_ref, xm_ref, ym_ref, fx_ref, fy_ref):
        # x_ref: (BB, Lx, Hp), y_ref: (BB, Ly, Hp)  -- already in matmul dtype
        # xm_ref: (BB, Lx, 1) f32, ym_ref: (BB, 1, Ly) f32
        x = x_ref[...]
        y = y_ref[...]
        xm = xm_ref[...]
        ym = ym_ref[...]

        # attn[b,l,m] = sum_d x[b,l,d] * y[b,m,d]  (contract last dims; no y^T)
        attn = lax.dot_general(
            x, y,
            dimension_numbers=(((2,), (2,)), ((0,), (0,))),
            preferred_element_type=jnp.float32,
        ) * temperature                                         # (BB, Lx, Ly) f32

        # masked_fill_(x_mask (x) y_mask != 0, -inf) -- faithful to PyTorch.
        mask = (xm != 0.0) & (ym != 0.0)                        # -> (BB, Lx, Ly)
        attn = jnp.where(mask, -jnp.inf, attn)

        # Single shared exponential: a per-batch global shift is a valid
        # softmax shift for either axis (overflow-safe; only last-ulp
        # underflow differs from per-row/col max subtraction).
        c = jnp.max(jnp.max(attn, axis=2, keepdims=True), axis=1, keepdims=True)
        e = jnp.exp(attn - c)                                   # (BB, Lx, Ly) f32

        inv_row = pl.reciprocal(jnp.sum(e, axis=2, keepdims=True),
                                approx=True)                    # (BB, Lx, 1)
        inv_col = pl.reciprocal(jnp.sum(e, axis=1, keepdims=True),
                                approx=True)                    # (BB, 1, Ly)

        e_mx = e.astype(x.dtype)

        # feature_x = softmax(attn, axis=2) @ y = (e @ y) scaled per-row by
        # inv_row -- normalization folded into the (Lx, Hp) output instead of
        # a full (Lx, Ly) multiply.
        fx = lax.dot_general(
            e_mx, y,
            dimension_numbers=(((2,), (1,)), ((0,), (0,))),
            preferred_element_type=jnp.float32,
        )                                                       # (BB, Lx, Hp)
        fx_ref[...] = (fx * inv_row).astype(fx_ref.dtype)

        # feature_y = softmax(attn, axis=1)^T @ x.  inv_col is a lane vector,
        # so pre-scaling e is a natural lane broadcast (avoids a
        # (1,Ly)->(Ly,1) relayout of the reciprocal).
        attn_x = (e * inv_col).astype(x.dtype)                  # (BB, Lx, Ly)
        # NOTE: contracting dim 1 of attn_x with dim 1 of x is a
        # transposed-LHS matmul; if the Mosaic dump shows a per-batch vxpose
        # here, restructure with one explicit transpose of e instead.
        fy_ref[...] = lax.dot_general(
            attn_x, x,
            dimension_numbers=(((1,), (1,)), ((0,), (0,))),
            preferred_element_type=jnp.float32,
        ).astype(fy_ref.dtype)                                  # (BB, Ly, Hp)

    return kernel


def _tpu_generation():
    """Returns (vmem_limit_bytes, block-batch VMEM budget, TensorCores/chip)."""
    kind = ""
    try:
        kind = jax.devices()[0].device_kind.lower()
    except Exception:
        pass
    mib = 1024 * 1024
    if "v7" in kind:            # 64 MiB physical VMEM per TC, 2 TCs / chip
        return 48 * mib, 28 * mib, 2
    if "v6" in kind:            # 128 MiB physical VMEM, 1 TC
        return 100 * mib, 64 * mib, 1
    if "v5p" in kind:           # 128 MiB physical VMEM, 2 TCs (megacore)
        return 100 * mib, 48 * mib, 2
    if "v5" in kind:            # v5e / v5 lite: 128 MiB physical VMEM, 1 TC
        return 100 * mib, 48 * mib, 1
    if "v4" in kind:            # 2 TCs (megacore)
        return 100 * mib, 48 * mib, 2
    # Unknown backend: conservative values that fit every generation.
    return 48 * mib, 24 * mib, 1


def _pick_block_batch(B, Lx, Ly, Hp, io_bytes, num_cores, vmem_budget_bytes):
    """How many batches to pack per grid step."""
    # Per-batch VMEM estimate:
    #   x / y / fx / fy tiles, double-buffered by the pipeline
    #   masks (f32), double-buffered
    #   ~3 live (Lx, Ly) f32-equivalent intermediates (attn/e + scaled/cast copy)
    per_batch = (2 * 2 * io_bytes * (Lx + Ly) * Hp
                 + 2 * 4 * (Lx + Ly)
                 + 4 * 3 * Lx * Ly)
    bb = max(1, min(B, vmem_budget_bytes // max(per_batch, 1)))
    while B % bb:                       # full blocks only (no ragged tail)
        bb -= 1
    if num_cores > 1:
        # Prefer a grid-step count that is a multiple of the TensorCore count
        # so the "parallel" batch axis load-balances (no idle TC on the last
        # wave).  Single-TC chips keep the largest BB (fewer steps = less
        # per-step pipeline overhead).
        cand = bb
        while cand > 1 and ((B % cand) or ((B // cand) % num_cores)):
            cand -= 1
        if B % cand == 0 and (B // cand) % num_cores == 0:
            bb = cand
    return bb


def alignment_forward(x, y, x_mask, y_mask, temperature, *,
                      matmul_dtype=None, block_batch=None, out_dtype=None,
                      pad_hidden=True):
    """Pallas implementation of Alignment.forward.

    x: (B, Lx, H), y: (B, Ly, H); x_mask: (B, Lx), y_mask: (B, Ly).
    temperature: python float (the nn.Parameter value).
    matmul_dtype: dtype for MXU operands (jnp.bfloat16 halves DMA bytes and
                  uses native MXU throughput; f32 accumulation either way).
    Returns (feature_x (B, Lx, H), feature_y (B, Ly, H)).
    """
    B, Lx, H = x.shape
    _, Ly, _ = y.shape
    matmul_dtype = x.dtype if matmul_dtype is None else matmul_dtype
    out_dtype = matmul_dtype if out_dtype is None else out_dtype

    # Cast once in the wrapper (bf16 end-to-end): halves HBM<->VMEM DMA bytes
    # and removes per-step full-tile casts inside the kernel.
    x = x.astype(matmul_dtype)
    y = y.astype(matmul_dtype)

    # Lane-dense hidden dim: pad H to a multiple of 128 so x/y/fx/fy slabs DMA
    # unstrided and output stores are unmasked.  Zero columns contribute
    # nothing to attn or the features; sliced off after the call.
    Hp = H
    if pad_hidden and H % 128:
        Hp = -(-H // 128) * 128
        x = jnp.pad(x, ((0, 0), (0, 0), (0, Hp - H)))
        y = jnp.pad(y, ((0, 0), (0, 0), (0, Hp - H)))

    xm = x_mask.astype(jnp.float32).reshape(B, Lx, 1)
    ym = y_mask.astype(jnp.float32).reshape(B, 1, Ly)

    vmem_limit, bb_budget, num_cores = _tpu_generation()
    io_bytes = jnp.dtype(matmul_dtype).itemsize
    BB = (_pick_block_batch(B, Lx, Ly, Hp, io_bytes, num_cores, bb_budget)
          if block_batch is None else block_batch)
    assert B % BB == 0, "block_batch must divide B"
    grid = (B // BB,)

    kernel = _make_alignment_kernel(float(temperature))

    grid_spec = pltpu.PrefetchScalarGridSpec(
        num_scalar_prefetch=0,
        grid=grid,
        in_specs=[
            pl.BlockSpec((BB, Lx, Hp), lambda b: (b, 0, 0)),   # x
            pl.BlockSpec((BB, Ly, Hp), lambda b: (b, 0, 0)),   # y
            pl.BlockSpec((BB, Lx, 1), lambda b: (b, 0, 0)),    # x_mask
            pl.BlockSpec((BB, 1, Ly), lambda b: (b, 0, 0)),    # y_mask
        ],
        out_specs=[
            pl.BlockSpec((BB, Lx, Hp), lambda b: (b, 0, 0)),   # feature_x
            pl.BlockSpec((BB, Ly, Hp), lambda b: (b, 0, 0)),   # feature_y
        ],
    )

    feature_x, feature_y = pl.pallas_call(
        kernel,
        out_shape=(
            jax.ShapeDtypeStruct((B, Lx, Hp), out_dtype),
            jax.ShapeDtypeStruct((B, Ly, Hp), out_dtype),
        ),
        grid_spec=grid_spec,
        compiler_params=pltpu.CompilerParams(
            dimension_semantics=("parallel",),
            vmem_limit_bytes=int(vmem_limit)),
    )(x, y, xm, ym)

    if Hp != H:
        feature_x = feature_x[..., :H]
        feature_y = feature_y[..., :H]
    return feature_x, feature_y


def _reference_forward(x, y, x_mask, y_mask, temperature):
    """Pure-JAX reference mirroring the PyTorch code."""
    attn = jnp.einsum("bld,bmd->blm", x, y) * temperature
    mask = (x_mask.astype(jnp.float32)[:, :, None]
            * y_mask.astype(jnp.float32)[:, None, :]) != 0.0
    attn = jnp.where(mask, -jnp.inf, attn)
    attn_x = jax.nn.softmax(attn, axis=1)
    attn_y = jax.nn.softmax(attn, axis=2)
    feature_y = jnp.einsum("blm,bld->bmd", attn_x, x)
    feature_x = jnp.einsum("blm,bmd->bld", attn_y, y)
    return feature_x, feature_y


if __name__ == "__main__":
    # Module default hidden_size=100 -> temperature = 1/sqrt(100).
    B, Lx, Ly, H = 4, 16, 24, 100
    temperature = 1.0 / math.sqrt(H)

    key = jax.random.PRNGKey(0)
    kx, ky, kmx, kmy = jax.random.split(key, 4)
    x = jax.random.normal(kx, (B, Lx, H), dtype=jnp.float32)
    y = jax.random.normal(ky, (B, Ly, H), dtype=jnp.float32)
    # Masks with at least one zero per batch so no full row/col of attn is
    # fully masked (avoids NaN softmax, matching finite PyTorch behaviour).
    x_mask = (jax.random.uniform(kmx, (B, Lx)) > 0.5).astype(jnp.int32)
    y_mask = (jax.random.uniform(kmy, (B, Ly)) > 0.5).astype(jnp.int32)
    x_mask = x_mask.at[:, 0].set(0)
    y_mask = y_mask.at[:, 0].set(0)

    fx_ref, fy_ref = _reference_forward(x, y, x_mask, y_mask, temperature)

    # f32 MXU operands: faithful to the PyTorch module's numerics.
    fx, fy = alignment_forward(x, y, x_mask, y_mask, temperature,
                               matmul_dtype=jnp.float32)
    jax.block_until_ready((fx, fy))
    assert fx.shape == (B, Lx, H) and fy.shape == (B, Ly, H)
    assert jnp.allclose(fx, fx_ref, atol=5e-3, rtol=5e-3), "feature_x mismatch (f32)"
    assert jnp.allclose(fy, fy_ref, atol=5e-3, rtol=5e-3), "feature_y mismatch (f32)"

    # bf16 end-to-end (bf16 DMA + native MXU, f32 accumulation).
    fx_b, fy_b = alignment_forward(x, y, x_mask, y_mask, temperature,
                                   matmul_dtype=jnp.bfloat16)
    jax.block_until_ready((fx_b, fy_b))
    assert jnp.allclose(fx_b.astype(jnp.float32), fx_ref,
                        atol=1e-1, rtol=1e-1), "feature_x mismatch (bf16)"
    assert jnp.allclose(fy_b.astype(jnp.float32), fy_ref,
                        atol=1e-1, rtol=1e-1), "feature_y mismatch (bf16)"

    print("KERNEL_OK")
</pallas_src>

<mosaic_0001>
module attributes {stable_mosaic.version = 11 : i64} {
  func.func @kernel(%arg0: i32, %arg1: memref<4x16x128xf32, #tpu.memory_space<vmem>>, %arg2: memref<4x24x128xf32, #tpu.memory_space<vmem>>, %arg3: memref<4x16x1xf32, #tpu.memory_space<vmem>>, %arg4: memref<4x1x24xf32, #tpu.memory_space<vmem>>, %arg5: memref<4x16x128xf32, #tpu.memory_space<vmem>>, %arg6: memref<4x24x128xf32, #tpu.memory_space<vmem>>) attributes {dimension_semantics = [#tpu.dimension_semantics<parallel>], iteration_bounds = array<i64: 1>, scalar_prefetch = 0 : i64, scratch_operands = 0 : i64, tpu.core_type = #tpu.core_type<tc>, window_params = [{transform_indices = @transform_0, window_bounds = array<i64: 4, 16, 128>}, {transform_indices = @transform_1, window_bounds = array<i64: 4, 24, 128>}, {transform_indices = @transform_2, window_bounds = array<i64: 4, 16, 1>}, {transform_indices = @transform_3, window_bounds = array<i64: 4, 1, 24>}, {transform_indices = @transform_4, window_bounds = array<i64: 4, 16, 128>}, {transform_indices = @transform_5, window_bounds = array<i64: 4, 24, 128>}]} {
    %c0 = arith.constant 0 : index
    %c0_0 = arith.constant 0 : index
    %c0_1 = arith.constant 0 : index
    %0 = vector.load %arg1[%c0, %c0_0, %c0_1] : memref<4x16x128xf32, #tpu.memory_space<vmem>>, vector<4x16x128xf32>
    %c0_2 = arith.constant 0 : index
    %c0_3 = arith.constant 0 : index
    %c0_4 = arith.constant 0 : index
    %1 = vector.load %arg2[%c0_2, %c0_3, %c0_4] : memref<4x24x128xf32, #tpu.memory_space<vmem>>, vector<4x24x128xf32>
    %c0_5 = arith.constant 0 : index
    %c0_6 = arith.constant 0 : index
    %c0_7 = arith.constant 0 : index
    %2 = vector.load %arg3[%c0_5, %c0_6, %c0_7] : memref<4x16x1xf32, #tpu.memory_space<vmem>>, vector<4x16x1xf32>
    %c0_8 = arith.constant 0 : index
    %c0_9 = arith.constant 0 : index
    %c0_10 = arith.constant 0 : index
    %3 = vector.load %arg4[%c0_8, %c0_9, %c0_10] : memref<4x1x24xf32, #tpu.memory_space<vmem>>, vector<4x1x24xf32>
    %cst = arith.constant dense<0.000000e+00> : vector<4x16x24xf32>
    %4 = tpu.matmul %0, %1, %cst {dimension_numbers = #tpu.dot_dimension_numbers<[2], [2], [1], [1], [0, 0, 0, 1, 1, 1], [0], [0]>} : vector<4x16x128xf32>, vector<4x24x128xf32>, vector<4x16x24xf32> -> vector<4x16x24xf32>
    %cst_11 = arith.constant 1.000000e-01 : f32
    %5 = vector.broadcast %cst_11 : f32 to vector<4x16x24xf32>
    %6 = arith.mulf %4, %5 : vector<4x16x24xf32>
    %cst_12 = arith.constant 0.000000e+00 : f32
    %7 = vector.broadcast %cst_12 : f32 to vector<4x16x1xf32>
    %8 = arith.cmpf one, %2, %7 : vector<4x16x1xf32>
    %cst_13 = arith.constant 0.000000e+00 : f32
    %9 = vector.broadcast %cst_13 : f32 to vector<4x1x24xf32>
    %10 = arith.cmpf one, %3, %9 : vector<4x1x24xf32>
    %11 = vector.broadcast %8 : vector<4x16x1xi1> to vector<4x16x24xi1>
    %12 = vector.broadcast %10 : vector<4x1x24xi1> to vector<4x16x24xi1>
    %13 = arith.andi %11, %12 : vector<4x16x24xi1>
    %cst_14 = arith.constant 0xFF800000 : f32
    %14 = vector.broadcast %cst_14 : f32 to vector<4x16x24xf32>
    %15 = arith.select %13, %14, %6 : vector<4x16x24xi1>, vector<4x16x24xf32>
    %cst_15 = arith.constant dense<0xFF800000> : vector<4x16xf32>
    %16 = vector.multi_reduction <maximumf>, %15, %cst_15 [2] : vector<4x16x24xf32> to vector<4x16xf32>
    %17 = vector.shape_cast %16 : vector<4x16xf32> to vector<4x16x1xf32>
    %cst_16 = arith.constant dense<0xFF800000> : vector<4x1xf32>
    %18 = vector.multi_reduction <maximumf>, %17, %cst_16 [1] : vector<4x16x1xf32> to vector<4x1xf32>
    %19 = vector.shape_cast %18 : vector<4x1xf32> to vector<4x1x1xf32>
    %20 = vector.broadcast %19 : vector<4x1x1xf32> to vector<4x16x24xf32>
    %21 = arith.subf %15, %20 : vector<4x16x24xf32>
    %22 = math.exp %21 : vector<4x16x24xf32>
    %cst_17 = arith.constant dense<0.000000e+00> : vector<4x16xf32>
    %23 = vector.multi_reduction <add>, %22, %cst_17 [2] : vector<4x16x24xf32> to vector<4x16xf32>
    %24 = vector.shape_cast %23 : vector<4x16xf32> to vector<4x16x1xf32>
    %25 = tpu.reciprocal %24 {approx = true} : vector<4x16x1xf32> -> vector<4x16x1xf32>
    %cst_18 = arith.constant dense<0.000000e+00> : vector<4x24xf32>
    %26 = vector.multi_reduction <add>, %22, %cst_18 [1] : vector<4x16x24xf32> to vector<4x24xf32>
    %27 = vector.shape_cast %26 : vector<4x24xf32> to vector<4x1x24xf32>
    %28 = tpu.reciprocal %27 {approx = true} : vector<4x1x24xf32> -> vector<4x1x24xf32>
    %cst_19 = arith.constant dense<0.000000e+00> : vector<4x16x128xf32>
    %29 = tpu.matmul %22, %1, %cst_19 {dimension_numbers = #tpu.dot_dimension_numbers<[2], [1], [1], [2], [0, 0, 0, 1, 1, 2], [0], [0]>} : vector<4x16x24xf32>, vector<4x24x128xf32>, vector<4x16x128xf32> -> vector<4x16x128xf32>
    %30 = vector.broadcast %25 : vector<4x16x1xf32> to vector<4x16x128xf32>
    %31 = arith.mulf %29, %30 : vector<4x16x128xf32>
    %c0_20 = arith.constant 0 : index
    %c0_21 = arith.constant 0 : index
    %c0_22 = arith.constant 0 : index
    %32 = vector.load %arg5[%c0_20, %c0_21, %c0_22] : memref<4x16x128xf32, #tpu.memory_space<vmem>>, vector<4x16x128xf32>
    tpu.vector_store %arg5[%c0_20, %c0_21, %c0_22], %31 {strides = array<i32>} : memref<4x16x128xf32, #tpu.memory_space<vmem>>, vector<4x16x128xf32>,
    %33 = vector.broadcast %28 : vector<4x1x24xf32> to vector<4x16x24xf32>
    %34 = arith.mulf %22, %33 : vector<4x16x24xf32>
    %cst_23 = arith.constant dense<0.000000e+00> : vector<4x24x128xf32>
    %35 = tpu.matmul %34, %0, %cst_23 {dimension_numbers = #tpu.dot_dimension_numbers<[1], [1], [2], [2], [0, 0, 0, 2, 1, 2], [0], [0]>} : vector<4x16x24xf32>, vector<4x16x128xf32>, vector<4x24x128xf32> -> vector<4x24x128xf32>
    %c0_24 = arith.constant 0 : index
    %c0_25 = arith.constant 0 : index
    %c0_26 = arith.constant 0 : index
    %36 = vector.load %arg6[%c0_24, %c0_25, %c0_26] : memref<4x24x128xf32, #tpu.memory_space<vmem>>, vector<4x24x128xf32>
    tpu.vector_store %arg6[%c0_24, %c0_25, %c0_26], %35 {strides = array<i32>} : memref<4x24x128xf32, #tpu.memory_space<vmem>>, vector<4x24x128xf32>,
    return
  }
  func.func @transform_0(%arg0: i32) -> (i32, i32, i32) {
    %c0_i32 = arith.constant 0 : i32
    %c0_i32_0 = arith.constant 0 : i32
    %c0_i32_1 = arith.constant 0 : i32
    return %arg0, %c0_i32, %c0_i32_0 : i32, i32, i32
  }
  func.func @transform_1(%arg0: i32) -> (i32, i32, i32) {
    %c0_i32 = arith.constant 0 : i32
    %c0_i32_0 = arith.constant 0 : i32
    %c0_i32_1 = arith.constant 0 : i32
    return %arg0, %c0_i32, %c0_i32_0 : i32, i32, i32
  }
  func.func @transform_2(%arg0: i32) -> (i32, i32, i32) {
    %c0_i32 = arith.constant 0 : i32
    %c0_i32_0 = arith.constant 0 : i32
    %c0_i32_1 = arith.constant 0 : i32
    return %arg0, %c0_i32, %c0_i32_0 : i32, i32, i32
  }
  func.func @transform_3(%arg0: i32) -> (i32, i32, i32) {
    %c0_i32 = arith.constant 0 : i32
    %c0_i32_0 = arith.constant 0 : i32
    %c0_i32_1 = arith.constant 0 : i32
    return %arg0, %c0_i32, %c0_i32_0 : i32, i32, i32
  }
  func.func @transform_4(%arg0: i32) -> (i32, i32, i32) {
    %c0_i32 = arith.constant 0 : i32
    %c0_i32_0 = arith.constant 0 : i32
    %c0_i32_1 = arith.constant 0 : i32
    return %arg0, %c0_i32, %c0_i32_0 : i32, i32, i32
  }
  func.func @transform_5(%arg0: i32) -> (i32, i32, i32) {
    %c0_i32 = arith.constant 0 : i32
    %c0_i32_0 = arith.constant 0 : i32
    %c0_i32_1 = arith.constant 0 : i32
    return %arg0, %c0_i32, %c0_i32_0 : i32, i32, i32
  }
}

</mosaic_0001>

<bundles_post_ra>
// kernel: tpu_custom_call.1
= control target key start
LH: loop header
LB: loop body
LE: loop exit
PB: predicated region body
PF: predicated region fallthrough
CT: control target
= control target key end

     0   :  { %11 = vsyncpa [#allocation3], 0  ;;  %s1249_s0 = inlined_call_operand.vmem [shape: f32[4,16,128], index: 0, kind: input, shape index: {}]   ;;  %s1250_s1 = inlined_call_operand.hbm [shape: f32[4,24,128], index: 1, kind: input, shape index: {}]   ;;  %s1251_s2 = inlined_call_operand.vmem [shape: f32[4,16,1], index: 2, kind: input, shape index: {}]   ;;  %s1252_s3 = inlined_call_operand.vmem [shape: f32[4,1,24], index: 3, kind: input, shape index: {}]   ;;  %s1253_s4 = inlined_call_operand.hbm [shape: f32[4,16,128], index: 4, kind: output, shape index: {0}]   ;;  %s1254_s5 = inlined_call_operand.hbm [shape: f32[4,24,128], index: 5, kind: output, shape index: {1}]  }
   0x1   :  { %12 = vsyncpa [#allocation4], 0 }
   0x2   :  { %13 = vsyncpa [#allocation7], 0  ;;  %s20_s20 = sshll.u32 %s1250_s1, 4  ;;  %s996_s21 = smov [#allocation2]   ;;  %s21_s20 = int_to_ptr.hbm [resolvable:$true] %s20_s20 }
   0x3   :  { %s22_s22 = sshll.u32 %s996_s21, 4  ;;  %s997_s23 = smov 128   ;;  %s23_s22 = int_to_ptr.vmem [resolvable:$true] %s22_s22 }
   0x4   :  { %s998_s24 = smov 8  }
   0x5   :  { %28 = dma.hbm_to_vmem [thread:$0]  %s21_s20, 1536, %s23_s22, [#allocation3], %s997_s23, %s997_s23, %s998_s24  }
   0x6   :  { %990 = dma.done.wait [#allocation3], 1536  }
   0x7   :  { %991 = vsyncadd [#allocation3], 4294965760  ;;  %v999_v0 = vmov 0   ;;  %v47_v1 = vld [vmem:[#allocation2 + $0x10] sm:$0xff]  ;;  %v53_v2 = vld [vmem:[#allocation2 + $0x40] sm:$0xff]  ;;  %vm249_vm15 = vcmask 195584  }
   0x8   :  { %875 = vset.pattern.permute.xlu0 %v999_v0  ;;  %876 = vset.pattern.permute.xlu1 %v999_v0  ;;  %v56_v3 = vld [vmem:[#allocation2 + $0x58] sm:$0xff]  ;;  %v46_v4 = vld [vmem:[#allocation2 + $0x8] sm:$0xff]  ;;  %v55_v7 = vld [vmem:[#allocation2 + $0x50] sm:$0xff]  ;;  %s817_s16 = sshll.u32 %s1253_s4, 4  ;;  %s1001_s4 = smov [#allocation6]   ;;  %s818_s16 = int_to_ptr.hbm [resolvable:$true] %s817_s16 }
   0x9   :  { %877 = vset.pattern.permute.xlu2 %v999_v0  ;;  %82 = vmatpush.xpose.msra.mxu0 %v47_v1  ;;  %v52_v5 = vld [vmem:[#allocation2 + $0x38] sm:$0xff]  ;;  %v50_v6 = vld [vmem:[#allocation2 + $0x28] sm:$0xff]  ;;  %v49_v8 = vld [vmem:[#allocation2 + $0x20] sm:$0xff]  ;;  %s828_s17 = sshll.u32 %s1001_s4, 4  ;;  %s830_s20 = sshll.u32 %s1254_s5, 4  ;;  %s829_s17 = int_to_ptr.vmem [resolvable:$true] %s828_s17  ;;  %s831_s20 = int_to_ptr.hbm [resolvable:$true] %s830_s20 }
   0xa   :  { %128 = vmatpush.xpose.msra.mxu2 %v53_v2  ;;  %151 = vmatpush.xpose.msra.mxu3 %v56_v3  ;;  %v61_v9 = vld [vmem:[%s1251_s2 + $0x20] sm:$0xff]  ;;  %v51_v11 = vld [vmem:[#allocation2 + $0x30] sm:$0xff]  ;;  %v62_v13 = vld [vmem:[%s1251_s2 + $0x28] sm:$0xff] }
   0xb   :  { %105 = vmatpush.xpose.msra.mxu1 %v50_v6  ;;  %vm173_vm0 = vcmp.ne.f32.partialorder %v61_v9, 0.0  ;;  %v45_v10 = vld [vmem:[#allocation2] sm:$0xff]  ;;  %v54_v14 = vld [vmem:[#allocation2 + $0x48] sm:$0xff]  ;;  %v63_v15 = vld [vmem:[%s1251_s2 + $0x30] sm:$0xff]  ;;  %vm174_vm2 = vcmp.ne.f32.partialorder %v62_v13, 0.0 }
   0xc   :  { %v185_v12 = vsel %vm173_vm0, 1, %v999_v0  ;;  %v48_v16 = vld [vmem:[#allocation2 + $0x18] sm:$0xff]  ;;  %vm175_vm1 = vcmp.ne.f32.partialorder %v63_v15, 0.0  ;;  %v57_v17 = vld [vmem:[%s1251_s2] sm:$0xff]  ;;  %v43_v22 = vld [vmem:[%s1249_s0 + $0x30] sm:$0xff]  ;;  %v186_v25 = vsel %vm174_vm2, 1, %v999_v0 }
   0xd   :  { %83 = vmatpush.xpose.msra.mxu0 %v46_v4  ;;  %202 = vperm.xlu0 %875, %v185_v12   ;;  %v37_v18 = vld [vmem:[%s1249_s0] sm:$0xff]  ;;  %v187_v20 = vsel %vm175_vm1, 1, %v999_v0  ;;  %v64_v21 = vld [vmem:[%s1251_s2 + $0x38] sm:$0xff]  ;;  %vm169_vm3 = vcmp.ne.f32.partialorder %v57_v17, 0.0  ;;  %v39_v23 = vld [vmem:[%s1249_s0 + $0x10] sm:$0xff] }
   0xe   :  { %129 = vmatpush.xpose.msra.mxu2 %v52_v5  ;;  %152 = vmatpush.xpose.msra.mxu3 %v55_v7  ;;  %v41_v19 = vld [vmem:[%s1249_s0 + $0x20] sm:$0xff]  ;;  %v181_v24 = vsel %vm169_vm3, 1, %v999_v0  ;;  %vm176_vm4 = vcmp.ne.f32.partialorder %v64_v21, 0.0  ;;  %v58_v26 = vld [vmem:[%s1251_s2 + $0x8] sm:$0xff]  ;;  %v59_v27 = vld [vmem:[%s1251_s2 + $0x10] sm:$0xff] }
   0xf   :  { %106 = vmatpush.xpose.msra.mxu1 %v49_v8  ;;  %208 = vperm.xlu1 %876, %v187_v20   ;;  %v188_v28 = vsel %vm176_vm4, 1, %v999_v0  ;;  %vm170_vm5 = vcmp.ne.f32.partialorder %v58_v26, 0.0  ;;  %v42_v29 = vld [vmem:[%s1249_s0 + $0x28] sm:$0xff]  ;;  %vm171_vm6 = vcmp.ne.f32.partialorder %v59_v27, 0.0  ;;  %v60_v31 = vld [vmem:[%s1251_s2 + $0x18] sm:$0xff] }
  0x10   :  { %190 = vperm.xlu2 %877, %v181_v24   ;;  %v38_v30 = vld [vmem:[%s1249_s0 + $0x8] sm:$0xff]  ;;  %v44_v32 = vld [vmem:[%s1249_s0 + $0x38] sm:$0xff]  ;;  %v182_v33 = vsel %vm170_vm5, 1, %v999_v0  ;;  %v183_v35 = vsel %vm171_vm6, 1, %v999_v0  ;;  %vm172_vm7 = vcmp.ne.f32.partialorder %v60_v31, 0.0 }
  0x11   :  { %84 = vmatpush.xpose.msra.mxu0 %v45_v10  ;;  %v40_v34 = vld [vmem:[%s1249_s0 + $0x18] sm:$0xff]  ;;  %v184_v36 = vsel %vm172_vm7, 1, %v999_v0  ;;  %v65_v37 = vld [vmem:[%s1252_s3] sm:$0x1]  ;;  %v67_v39 = vld [vmem:[%s1252_s3 + $0x2] sm:$0x1] }
  0x12   :  { %130 = vmatpush.xpose.msra.mxu2 %v51_v11  ;;  %153 = vmatpush.xpose.msra.mxu3 %v54_v14  ;;  %vm177_vm8 = vcmp.ne.f32.partialorder %v65_v37, 0.0  ;;  %v68_v41 = vld [vmem:[%s1252_s3 + $0x3] sm:$0x1]  ;;  %vm179_vm9 = vcmp.ne.f32.partialorder %v67_v39, 0.0  ;;  %v66_v49 = vld [vmem:[%s1252_s3 + $0x1] sm:$0x1] }
  0x13   :  { %107 = vmatpush.xpose.msra.mxu1 %v48_v16  ;;  %v221_v40 = vsel %vm177_vm8, 1, %v999_v0  ;;  %vm180_vm10 = vcmp.ne.f32.partialorder %v68_v41, 0.0  ;;  %v223_v44 = vsel %vm179_vm9, 1, %v999_v0  ;;  %vm178_vm14 = vcmp.ne.f32.partialorder %v66_v49, 0.0  ;;  %s1000_s3 = smov [#allocation5]  }
  0x14   :  { %85 = vmatmul.f32.vlgmr.msra.gmra.mxu0 %v37_v18  ;;  %v225_v42 = vperm.slane %v221_v40, 0  ;;  %v224_v48 = vsel %vm180_vm10, 1, %v999_v0  ;;  %v227_v50 = vperm.slane %v223_v44, 0  ;;  %v222_v56 = vsel %vm178_vm14, 1, %v999_v0  ;;  %s815_s13 = sshll.u32 %s1000_s3, 4  ;;  %s816_s13 = int_to_ptr.vmem [resolvable:$true] %s815_s13 }
  0x15   :  { %131 = vmatmul.f32.vlgmr.msra.gmra.mxu2 %v41_v19  ;;  %154 = vmatmul.f32.vlgmr.msra.gmra.mxu3 %v43_v22  ;;  %v228_v52 = vperm.slane %v224_v48, 0  ;;  %v226_v59 = vperm.slane %v222_v56, 0 }
  0x16   :  { %467 = vmatpush.msrb.mxu2 %v53_v2  ;;  %108 = vmatmul.f32.vlgmr.msra.gmra.mxu1 %v39_v23  ;;  %vm1108_vm11 = vcmp.eq.s32.totalorder %v225_v42, 1  ;;  %vm1118_vm0 = vcmp.eq.s32.totalorder %v227_v50, 1 }
  0x17   :  { %205 = vperm.xlu0 %875, %v186_v25   ;;  %496 = vmatpush.msrb.mxu3 %v56_v3  ;;  %vm1125_vm2 = vcmp.eq.s32.totalorder %v228_v52, 1  ;;  %vm1137_vm6 = vcmp.eq.s32.totalorder %v226_v59, 1 }
  0x18   :  { %468 = vmatpush.msrb.mxu2 %v52_v5  ;;  %409 = vmatpush.msrb.mxu0 %v47_v1 }
  0x19   :  { %497 = vmatpush.msrb.mxu3 %v55_v7  ;;  %438 = vmatpush.msrb.mxu1 %v50_v6 }
  0x1a   :  { %469 = vmatpush.msrb.mxu2 %v51_v11  ;;  %211 = vperm.xlu1 %876, %v188_v28  }
  0x1b   :  { %410 = vmatpush.msrb.mxu0 %v46_v4  ;;  %498 = vmatpush.msrb.mxu3 %v54_v14 }
  0x1c   :  { %439 = vmatpush.msrb.mxu1 %v49_v8  ;;  %88 = vmatmul.f32.gmra.mxu0 %v38_v30 }
  0x1d   :  { %134 = vmatmul.f32.gmra.mxu2 %v42_v29  ;;  %157 = vmatmul.f32.gmra.mxu3 %v44_v32 }
  0x1e   :  { %193 = vperm.xlu2 %877, %v182_v33   ;;  %111 = vmatmul.f32.gmra.mxu1 %v40_v34 }
  0x1f   :  { %411 = vmatpush.msrb.mxu0 %v45_v10  ;;  %196 = vperm.xlu0 %875, %v183_v35  }
  0x20   :  { %440 = vmatpush.msrb.mxu1 %v48_v16  ;;  %720 = vmatpush.msra.mxu2 %v42_v29 }
  0x21   :  { %787 = vmatpush.msra.mxu3 %v44_v32  ;;  %586 = vmatpush.msra.mxu0 %v38_v30 }
  0x22   :  { %653 = vmatpush.msra.mxu1 %v40_v34  ;;  %199 = vperm.xlu1 %876, %v184_v36  }
  0x23   :  { %721 = vmatpush.msra.mxu2 %v41_v19  ;;  %788 = vmatpush.msra.mxu3 %v43_v22 }
  0x24   :  { %654 = vmatpush.msra.mxu1 %v39_v23  ;;  %587 = vmatpush.msra.mxu0 %v37_v18 }
  0x6a   :  { %v191_v43 = vpop.permute.xlu2 %190 }
  0x6b   :  { %vm213_vm12 = vcmp.eq.s32.totalorder %v191_v43, 1 }
  0x6c   :  { %vm233_vm13 = vmand %vm213_vm12, %vm1108_vm11 }
  0x78   :  { %v194_v9 = vpop.permute.xlu2 %193 }
  0x79   :  { %vm214_vm14 = vcmp.eq.s32.totalorder %v194_v9, 1 }
  0x7f   :  { %v203_v38 = vpop.permute.xlu0 %202 }
  0x80   :  { %vm217_vm1 = vcmp.eq.s32.totalorder %v203_v38, 1 }
  0x81   :  { %v209_v45 = vpop.permute.xlu1 %208  ;;  %vm237_vm4 = vmand %vm217_vm1, %vm1118_vm0 }
  0x82   :  { %vm219_vm3 = vcmp.eq.s32.totalorder %v209_v45, 1 }
  0x83   :  { %vm239_vm5 = vmand %vm219_vm3, %vm1125_vm2 }
  0x89   :  { %v206_v46 = vpop.permute.xlu0 %205 }
  0x8a   :  { %vm218_vm9 = vcmp.eq.s32.totalorder %v206_v46, 1 }
  0x8c   :  { %v212_v61 = vpop.permute.xlu1 %211 }
  0x8d   :  { %vm220_vm8 = vcmp.eq.s32.totalorder %v212_v61, 1 }
  0x8e   :  { %vm240_vm12 = vmand %vm220_vm8, %vm1125_vm2 }
  0x91   :  { %v86_v51 = vpop.f32.mrf.mxu0  ;;  %v197_v62 = vpop.permute.xlu0 %196 }
  0x92   :  { %v161_v53 = vmul.f32 0.1, %v86_v51  ;;  %vm215_vm7 = vcmp.eq.s32.totalorder %v197_v62, 1 }
  0x93   :  { %v109_v2 = vpop.f32.mrf.mxu1  ;;  %vm235_vm10 = vmand %vm215_vm7, %vm1137_vm6 }
  0x94   :  { %v1122_v55 = vsel %vm233_vm13, -inf, %v161_v53  ;;  %v163_v7 = vmul.f32 0.1, %v109_v2  ;;  %vm238_vm13 = vmand %vm218_vm9, %vm1118_vm0  ;;  %v200_v15 = vpop.permute.xlu1 %199 }
  0x95   :  { %v250_v58 = vsel %vm249_vm15, %v1122_v55, -inf  ;;  %vm216_vm1 = vcmp.eq.s32.totalorder %v200_v15, 1  ;;  %vm234_vm0 = vmand %vm214_vm14, %vm1108_vm11  ;;  %vm562_vm11 = vcmask 130048  }
  0x96   :  { %251 = vmax.xlane.f32.xlu2 %v250_v58  ;;  %v1153_v16 = vsel %vm235_vm10, -inf, %v163_v7  ;;  %vm236_vm2 = vmand %vm216_vm1, %vm1137_vm6 }
  0x97   :  { %v256_v22 = vsel %vm249_vm15, %v1153_v16, -inf }
  0x98   :  { %v132_v60 = vpop.f32.mrf.mxu2  ;;  %v155_v0 = vpop.f32.mrf.mxu3 }
  0x99   :  { %v165_v63 = vmul.f32 0.1, %v132_v60  ;;  %v167_v1 = vmul.f32 0.1, %v155_v0  ;;  %v89_v13 = vpop.f32.mrf.mxu0 }
  0x9a   :  { %v162_v21 = vmul.f32 0.1, %v89_v13 }
  0x9b   :  { %v1135_v3 = vsel %vm237_vm4, -inf, %v165_v63  ;;  %v1141_v5 = vsel %vm239_vm5, -inf, %v167_v1  ;;  %v112_v18 = vpop.f32.mrf.mxu1 }
  0x9c   :  { %v268_v6 = vsel %vm249_vm15, %v1141_v5, -inf  ;;  %v262_v8 = vsel %vm249_vm15, %v1135_v3, -inf  ;;  %v164_v24 = vmul.f32 0.1, %v112_v18  ;;  %v242_v25 = vsel %vm234_vm0, -inf, %v162_v21 }
  0x9d   :  { %269 = vmax.xlane.f32.xlu1 %v268_v6  ;;  %v253_v27 = vsel %vm249_vm15, %v242_v25, -inf }
  0x9e   :  { %263 = vmax.xlane.f32.xlu2 %v262_v8  ;;  %v1163_v26 = vsel %vm236_vm2, -inf, %v164_v24 }
  0x9f   :  { %v259_v28 = vsel %vm249_vm15, %v1163_v26, -inf }
  0xa0   :  { %v135_v10 = vpop.f32.mrf.mxu2  ;;  %v158_v12 = vpop.f32.mrf.mxu3 }
  0xa1   :  { %v166_v11 = vmul.f32 0.1, %v135_v10  ;;  %v168_v14 = vmul.f32 0.1, %v158_v12 }
  0xa3   :  { %v246_v17 = vsel %vm238_vm13, -inf, %v166_v11  ;;  %v248_v20 = vsel %vm240_vm12, -inf, %v168_v14 }
  0xa4   :  { %v265_v19 = vsel %vm249_vm15, %v246_v17, -inf  ;;  %v271_v23 = vsel %vm249_vm15, %v248_v20, -inf }
  0xa5   :  { %266 = vmax.xlane.f32.xlu0 %v265_v19  ;;  %257 = vmax.xlane.f32.xlu1 %v256_v22 }
  0xa6   :  { %272 = vmax.xlane.f32.xlu2 %v271_v23 }
  0xad   :  { %254 = vmax.xlane.f32.xlu0 %v253_v27 }
  0xae   :  { %260 = vmax.xlane.f32.xlu2 %v259_v28 }
 0x109   :  { %v252_v29 = vpop.xlane.xlu2 %251 }
 0x110   :  { %v270_v31 = vpop.xlane.xlu1 %269 }
 0x111   :  { %v264_v30 = vpop.xlane.xlu2 %263 }
 0x118   :  { %v267_v32 = vpop.xlane.xlu0 %266  ;;  %v258_v45 = vpop.xlane.xlu1 %257 }
 0x119   :  { %v288_v33 = vmax.f32 %v264_v30, %v267_v32  ;;  %v273_v34 = vpop.xlane.xlu2 %272 }
 0x11a   :  { %v295_v36 = vmax.f32 %v270_v31, %v273_v34 }
 0x11b   :  { %v289_v35 = vrot.slane %v288_v33, 4 }
 0x11c   :  { %v296_v38 = vrot.slane %v295_v36, 4 }
 0x11d   :  { %v290_v37 = vmax.f32 %v288_v33, %v289_v35 }
 0x11e   :  { %v297_v40 = vmax.f32 %v295_v36, %v296_v38 }
 0x11f   :  { %v291_v39 = vrot.slane %v290_v37, 2 }
 0x120   :  { %v255_v41 = vpop.xlane.xlu0 %254  ;;  %v298_v43 = vrot.slane %v297_v40, 2 }
 0x121   :  { %v292_v42 = vmax.f32 %v290_v37, %v291_v39  ;;  %v274_v44 = vmax.f32 %v252_v29, %v255_v41  ;;  %v261_v46 = vpop.xlane.xlu2 %260 }
 0x122   :  { %v299_v48 = vmax.f32 %v297_v40, %v298_v43  ;;  %v281_v50 = vmax.f32 %v258_v45, %v261_v46 }
 0x123   :  { %v293_v47 = vrot.slane %v292_v42, 1  ;;  %v275_v49 = vrot.slane %v274_v44, 4 }
 0x124   :  { %v300_v52 = vrot.slane %v299_v48, 1  ;;  %v282_v54 = vrot.slane %v281_v50, 4 }
 0x125   :  { %v294_v51 = vmax.f32 %v292_v42, %v293_v47  ;;  %v276_v53 = vmax.f32 %v274_v44, %v275_v49 }
 0x126   :  { %v301_v57 = vmax.f32 %v299_v48, %v300_v52  ;;  %v283_v59 = vmax.f32 %v281_v50, %v282_v54 }
 0x127   :  { %v306_v56 = vsub.f32 %v1135_v3, %v294_v51  ;;  %v277_v58 = vrot.slane %v276_v53, 2  ;;  %v307_v60 = vsub.f32 %v246_v17, %v294_v51 }
 0x128   :  { %v308_v62 = vsub.f32 %v1141_v5, %v301_v57  ;;  %v284_v0 = vrot.slane %v283_v59, 2  ;;  %v309_v1 = vsub.f32 %v248_v20, %v301_v57 }
 0x129   :  { %v318_v61 = vmul.f32 1.442695, %v306_v56  ;;  %v278_v63 = vmax.f32 %v276_v53, %v277_v58  ;;  %v320_v7 = vmul.f32 1.442695, %v307_v60 }
 0x12a   :  { %v322_v2 = vmul.f32 1.442695, %v308_v62  ;;  %v285_v6 = vmax.f32 %v283_v59, %v284_v0  ;;  %v324_v10 = vmul.f32 1.442695, %v309_v1 }
 0x12b   :  { %878 = vpow2.f32 %v318_v61  ;;  %v279_v4 = vrot.slane %v278_v63, 1 }
 0x12c   :  { %880 = vpow2.f32 %v322_v2  ;;  %v286_v9 = vrot.slane %v285_v6, 1 }
 0x12d   :  { %v280_v8 = vmax.f32 %v278_v63, %v279_v4  ;;  %882 = vpow2.f32 %v320_v7 }
 0x12e   :  { %v287_v12 = vmax.f32 %v285_v6, %v286_v9  ;;  %884 = vpow2.f32 %v324_v10 }
 0x12f   :  { %v302_v3 = vsub.f32 %v1122_v55, %v280_v8  ;;  %v303_v11 = vsub.f32 %v242_v25, %v280_v8 }
 0x130   :  { %v304_v15 = vsub.f32 %v1153_v16, %v287_v12  ;;  %v305_v17 = vsub.f32 %v1163_v26, %v287_v12 }
 0x131   :  { %v1171_v13 = vpop.eup %878  ;;  %v310_v5 = vmul.f32 1.442695, %v302_v3  ;;  %v312_v14 = vmul.f32 1.442695, %v303_v11 }
 0x132   :  { %852 = vmatmul.msk.f32.vlgmr.msrb.gmra.mxu2 %vm249_vm15, %v1171_v13  ;;  %v1177_v18 = vpop.eup %880  ;;  %v314_v19 = vmul.f32 1.442695, %v304_v15  ;;  %v316_v55 = vmul.f32 1.442695, %v305_v17  ;;  %v1204_v34 = vsel %vm249_vm15, %v1171_v13, 0.0 }
 0x133   :  { %886 = vpow2.f32 %v310_v5  ;;  %854 = vmatmul.msk.f32.vlgmr.msrb.gmra.mxu3 %vm249_vm15, %v1177_v18  ;;  %v1181_v20 = vpop.eup %882  ;;  %v344_v44 = vsel %vm249_vm15, %v1177_v18, 0.0 }
 0x134   :  { %888 = vpow2.f32 %v312_v14  ;;  %v1183_v16 = vpop.eup %884  ;;  %v1208_v35 = vsel %vm249_vm15, %v1181_v20, 0.0 }
 0x135   :  { %890 = vpow2.f32 %v314_v19  ;;  %v372_v39 = vadd.f32 %v1208_v35, %v1204_v34  ;;  %v347_v45 = vsel %vm249_vm15, %v1183_v16, 0.0 }
 0x136   :  { %892 = vpow2.f32 %v316_v55  ;;  %v379_v48 = vadd.f32 %v347_v45, %v344_v44 }
 0x137   :  { %v373_v43 = vrot.slane %v372_v39, 4 }
 0x138   :  { %v380_v53 = vrot.slane %v379_v48, 4 }
 0x139   :  { %v887_v21 = vpop.eup %886  ;;  %v374_v47 = vadd.f32 %v373_v43, %v372_v39 }
 0x13a   :  { %853 = vmatmul.msk.f32.gmra.mxu2 %vm249_vm15, %v1181_v20  ;;  %v889_v22 = vpop.eup %888  ;;  %848 = vmatmul.msk.f32.vlgmr.msrb.gmra.mxu0 %vm249_vm15, %v887_v21  ;;  %v326_v23 = vsel %vm249_vm15, %v887_v21, 0.0  ;;  %v381_v57 = vadd.f32 %v380_v53, %v379_v48 }
 0x13b   :  { %v891_v24 = vpop.eup %890  ;;  %v329_v25 = vsel %vm249_vm15, %v889_v22, 0.0  ;;  %327 = vadd.xlane.f32.xlu2 %v326_v23  ;;  %855 = vmatmul.msk.f32.gmra.mxu3 %vm249_vm15, %v1183_v16  ;;  %v375_v51 = vrot.slane %v374_v47, 2 }
 0x13c   :  { %v893_v26 = vpop.eup %892  ;;  %330 = vadd.xlane.f32.xlu1 %v329_v25  ;;  %850 = vmatmul.msk.f32.vlgmr.msrb.gmra.mxu1 %vm249_vm15, %v891_v24  ;;  %v1194_v27 = vsel %vm249_vm15, %v891_v24, 0.0  ;;  %v358_v28 = vadd.f32 %v329_v25, %v326_v23  ;;  %v382_v60 = vrot.slane %v381_v57, 2 }
 0x13d   :  { %v1197_v29 = vsel %vm249_vm15, %v893_v26, 0.0  ;;  %v376_v56 = vadd.f32 %v375_v51, %v374_v47 }
 0x13e   :  { %v365_v30 = vadd.f32 %v1197_v29, %v1194_v27  ;;  %v359_v32 = vrot.slane %v358_v28, 4  ;;  %v383_v63 = vadd.f32 %v382_v60, %v381_v57 }
 0x13f   :  { %v377_v58 = vrot.slane %v376_v56, 1 }
 0x140   :  { %v366_v31 = vrot.slane %v365_v30, 4  ;;  %v360_v37 = vadd.f32 %v359_v32, %v358_v28  ;;  %v384_v1 = vrot.slane %v383_v63, 1 }
 0x141   :  { %v378_v61 = vadd.f32 %v377_v58, %v376_v56 }
 0x142   :  { %849 = vmatmul.msk.f32.gmra.mxu0 %vm249_vm15, %v889_v22  ;;  %v367_v33 = vadd.f32 %v366_v31, %v365_v30  ;;  %v361_v41 = vrot.slane %v360_v37, 2  ;;  %v385_v2 = vadd.f32 %v384_v1, %v383_v63 }
 0x144   :  { %851 = vmatmul.msk.f32.gmra.mxu1 %vm249_vm15, %v893_v26  ;;  %v368_v36 = vrot.slane %v367_v33, 2  ;;  %v362_v46 = vadd.f32 %v361_v41, %v360_v37 }
 0x146   :  { %v369_v38 = vadd.f32 %v368_v36, %v367_v33  ;;  %v363_v49 = vrot.slane %v362_v46, 1 }
 0x148   :  { %v370_v40 = vrot.slane %v369_v38, 1  ;;  %v364_v54 = vadd.f32 %v363_v49, %v362_v46 }
 0x14a   :  { %v371_v42 = vadd.f32 %v370_v40, %v369_v38 }
 0x14c   :  { %894 = vrcp.f32 %v371_v42 }
 0x14d   :  { %896 = vrcp.f32 %v364_v54 }
 0x14e   :  { %898 = vrcp.f32 %v378_v61 }
 0x14f   :  { %900 = vrcp.f32 %v385_v2 }
 0x152   :  { %v895_v50 = vpop.eup %894 }
 0x153   :  { %v524_v52 = vmul.f32 %v895_v50, %v891_v24  ;;  %v525_v59 = vmul.f32 %v895_v50, %v893_v26  ;;  %v897_v62 = vpop.eup %896 }
 0x154   :  { %v522_v0 = vmul.f32 %v897_v62, %v887_v21  ;;  %v899_v4 = vpop.eup %898  ;;  %v523_v6 = vmul.f32 %v897_v62, %v889_v22 }
 0x155   :  { %598 = vxpose.xlu0.b32.start [1/2] (short) (narrow) %v524_v52, 24  ;;  %v526_v7 = vmul.f32 %v899_v4, %v1171_v13  ;;  %v901_v8 = vpop.eup %900  ;;  %v527_v9 = vmul.f32 %v899_v4, %v1181_v20 }
 0x156   :  { %v528_v10 = vmul.f32 %v901_v8, %v1177_v18  ;;  %v529_v3 = vmul.f32 %v901_v8, %v1183_v16 }
 0x15d   :  { %599 = vxpose.xlu0.b32.end [2/2] (short) (narrow) %v525_v59, 24 }
 0x164   :  { %530 = vxpose.xlu2.b32.start [1/2] (short) (narrow) %v522_v0, 24 }
 0x16c   :  { %531 = vxpose.xlu2.b32.end [2/2] (short) (narrow) %v523_v6, 24 }
 0x16d   :  { %665 = vxpose.xlu0.b32.start [1/2] (short) (narrow) %v526_v7, 24 }
 0x175   :  { %666 = vxpose.xlu0.b32.end [2/2] (short) (narrow) %v527_v9, 24 }
 0x176   :  { %732 = vxpose.xlu1.b32.start [1/2] (short) (narrow) %v528_v10, 24 }
 0x17e   :  { %733 = vxpose.xlu1.b32.end [2/2] (short) (narrow) %v529_v3, 24 }
 0x1ae   :  { %v328_v11 = vpop.xlane.xlu2 %327 }
 0x1af   :  { %902 = vrcp.f32 %v328_v11  ;;  %v331_v12 = vpop.xlane.xlu1 %330 }
 0x1b0   :  { %904 = vrcp.f32 %v331_v12 }
 0x1b5   :  { %v903_v5 = vpop.eup %902  ;;  %v471_v32 = vpop.f32.mrf.mxu2 }
 0x1b6   :  { %v905_v13 = vpop.eup %904  ;;  %v500_v41 = vpop.f32.mrf.mxu3 }
 0x1b7   :  { %v413_v14 = vpop.f32.mrf.mxu0 }
 0x1b8   :  { %v506_v15 = vmul.f32 %v903_v5, %v413_v14 }
 0x1ba   :  { %514 = vst [vmem:[#allocation5] sm:$0xff] %v506_v15 }
 0x1be   :  { %v503_v51 = vpop.f32.mrf.mxu3 }
 0x1bf   :  { %v416_v17 = vpop.f32.mrf.mxu0 }
 0x1c0   :  { %v507_v19 = vmul.f32 %v905_v13, %v416_v17 }
 0x1c2   :  { %515 = vst [vmem:[#allocation5 + $0x8] sm:$0xff] %v507_v19 }
 0x1e5   :  { %339 = vadd.xlane.f32.xlu2 %v1204_v34 }
 0x1e6   :  { %336 = vadd.xlane.f32.xlu1 %v1197_v29  ;;  %v442_v29 = vpop.f32.mrf.mxu1 }
 0x1ed   :  { %345 = vadd.xlane.f32.xlu2 %v344_v44  ;;  %v474_v44 = vpop.f32.mrf.mxu2 }
 0x1ee   :  { %333 = vadd.xlane.f32.xlu0 %v1194_v27  ;;  %342 = vadd.xlane.f32.xlu1 %v1208_v35  ;;  %v445_v35 = vpop.f32.mrf.mxu1 }
 0x1f6   :  { %348 = vadd.xlane.f32.xlu1 %v347_v45 }
 0x1f9   :  { %v614_v18 = vpop.trf.xlu0 }
 0x1fa   :  { %859 = vmatmul.msk.f32.vlgmr.msra.gmra.mxu1 %vm562_vm11, %v614_v18 }
 0x1fd   :  { %v546_v55 = vpop.trf.xlu2 }
 0x1fe   :  { %856 = vmatmul.msk.f32.vlgmr.msra.gmra.mxu0 %vm562_vm11, %v546_v55 }
 0x201   :  { %v615_v20 = vpop.trf.xlu0 }
 0x202   :  { %860 = vmatmul.msk.f32.gmra.mxu1 %vm562_vm11, %v615_v20 }
 0x205   :  { %v547_v16 = vpop.trf.xlu2 }
 0x206   :  { %857 = vmatmul.msk.f32.gmra.mxu0 %vm562_vm11, %v547_v16 }
 0x209   :  { %v616_v21 = vpop.trf.xlu0 }
 0x20a   :  { %861 = vmatmul.msk.f32.gmra.mxu1 %vm562_vm11, %v616_v21 }
 0x20d   :  { %v548_v22 = vpop.trf.xlu2 }
 0x20e   :  { %858 = vmatmul.msk.f32.gmra.mxu0 %vm562_vm11, %v548_v22 }
 0x211   :  { %v681_v23 = vpop.trf.xlu0 }
 0x212   :  { %862 = vmatmul.msk.f32.vlgmr.msra.gmra.mxu2 %vm562_vm11, %v681_v23 }
 0x219   :  { %v682_v24 = vpop.trf.xlu0 }
 0x21a   :  { %v748_v25 = vpop.trf.xlu1  ;;  %863 = vmatmul.msk.f32.gmra.mxu2 %vm562_vm11, %v682_v24 }
 0x21b   :  { %865 = vmatmul.msk.f32.vlgmr.msra.gmra.mxu3 %vm562_vm11, %v748_v25 }
 0x221   :  { %v683_v26 = vpop.trf.xlu0 }
 0x222   :  { %v749_v27 = vpop.trf.xlu1  ;;  %864 = vmatmul.msk.f32.gmra.mxu2 %vm562_vm11, %v683_v26 }
 0x223   :  { %866 = vmatmul.msk.f32.gmra.mxu3 %vm562_vm11, %v749_v27 }
 0x22a   :  { %v750_v28 = vpop.trf.xlu1 }
 0x22b   :  { %867 = vmatmul.msk.f32.gmra.mxu3 %vm562_vm11, %v750_v28 }
 0x258   :  { %v340_v30 = vpop.xlane.xlu2 %339 }
 0x259   :  { %v337_v31 = vpop.xlane.xlu1 %336  ;;  %906 = vrcp.f32 %v340_v30 }
 0x25a   :  { %908 = vrcp.f32 %v337_v31 }
 0x25f   :  { %v907_v33 = vpop.eup %906 }
 0x260   :  { %v909_v34 = vpop.eup %908  ;;  %v510_v36 = vmul.f32 %v907_v33, %v471_v32  ;;  %v346_v37 = vpop.xlane.xlu2 %345 }
 0x261   :  { %v509_v38 = vmul.f32 %v909_v34, %v445_v35  ;;  %v343_v39 = vpop.xlane.xlu1 %342  ;;  %910 = vrcp.f32 %v346_v37  ;;  %v334_v40 = vpop.xlane.xlu0 %333 }
 0x262   :  { %518 = vst [vmem:[#allocation5 + $0x20] sm:$0xff] %v510_v36  ;;  %912 = vrcp.f32 %v343_v39 }
 0x263   :  { %517 = vst [vmem:[#allocation5 + $0x18] sm:$0xff] %v509_v38  ;;  %914 = vrcp.f32 %v334_v40 }
 0x267   :  { %v911_v42 = vpop.eup %910 }
 0x268   :  { %v913_v43 = vpop.eup %912  ;;  %v512_v45 = vmul.f32 %v911_v42, %v500_v41 }
 0x269   :  { %v915_v46 = vpop.eup %914  ;;  %v511_v47 = vmul.f32 %v913_v43, %v474_v44  ;;  %v349_v48 = vpop.xlane.xlu1 %348 }
 0x26a   :  { %520 = vst [vmem:[#allocation5 + $0x30] sm:$0xff] %v512_v45  ;;  %v508_v49 = vmul.f32 %v915_v46, %v442_v29  ;;  %916 = vrcp.f32 %v349_v48 }
 0x26b   :  { %519 = vst [vmem:[#allocation5 + $0x28] sm:$0xff] %v511_v47 }
 0x26c   :  { %516 = vst [vmem:[#allocation5 + $0x10] sm:$0xff] %v508_v49 }
 0x270   :  { %v917_v50 = vpop.eup %916 }
 0x271   :  { %v513_v52 = vmul.f32 %v917_v50, %v503_v51 }
 0x273   :  { %521 = vst [vmem:[#allocation5 + $0x38] sm:$0xff] %v513_v52 }
 0x274   :  { %823 = dma.vmem_to_hbm [thread:$0]  %s816_s13, 1024, %s818_s16, [#allocation4], %s997_s23, %s997_s23, %s998_s24  }
 0x277   :  { %v656_v53 = vpop.f32.mrf.mxu1 }
 0x278   :  { %802 = vst [vmem:[#allocation6 + $0x18] sm:$0xff] %v656_v53 }
 0x27b   :  { %v589_v54 = vpop.f32.mrf.mxu0 }
 0x27c   :  { %799 = vst [vmem:[#allocation6] sm:$0xff] %v589_v54 }
 0x27f   :  { %v659_v56 = vpop.f32.mrf.mxu1 }
 0x280   :  { %803 = vst [vmem:[#allocation6 + $0x20] sm:$0xff] %v659_v56 }
 0x283   :  { %v592_v57 = vpop.f32.mrf.mxu0 }
 0x284   :  { %800 = vst [vmem:[#allocation6 + $0x8] sm:$0xff] %v592_v57 }
 0x287   :  { %v662_v58 = vpop.f32.mrf.mxu1 }
 0x288   :  { %804 = vst [vmem:[#allocation6 + $0x28] sm:$0xff] %v662_v58 }
 0x28b   :  { %v595_v59 = vpop.f32.mrf.mxu0 }
 0x28c   :  { %801 = vst [vmem:[#allocation6 + $0x10] sm:$0xff] %v595_v59 }
 0x295   :  { %v723_v60 = vpop.f32.mrf.mxu2 }
 0x296   :  { %805 = vst [vmem:[#allocation6 + $0x30] sm:$0xff] %v723_v60 }
 0x29d   :  { %v726_v61 = vpop.f32.mrf.mxu2 }
 0x29e   :  { %v790_v62 = vpop.f32.mrf.mxu3  ;;  %806 = vst [vmem:[#allocation6 + $0x38] sm:$0xff] %v726_v61 }
 0x29f   :  { %808 = vst [vmem:[#allocation6 + $0x48] sm:$0xff] %v790_v62 }
 0x2a5   :  { %v729_v63 = vpop.f32.mrf.mxu2 }
 0x2a6   :  { %v793_v0 = vpop.f32.mrf.mxu3  ;;  %807 = vst [vmem:[#allocation6 + $0x40] sm:$0xff] %v729_v63 }
 0x2a7   :  { %809 = vst [vmem:[#allocation6 + $0x50] sm:$0xff] %v793_v0 }
 0x2ae   :  { %v796_v1 = vpop.f32.mrf.mxu3 }
 0x2af   :  { %810 = vst [vmem:[#allocation6 + $0x58] sm:$0xff] %v796_v1 }
 0x2b0   :  { %836 = dma.vmem_to_hbm [thread:$0]  %s829_s17, 1536, %s831_s20, [#allocation7], %s997_s23, %s997_s23, %s998_s24  }
 0x2b1   :  { %992 = dma.done.wait [#allocation4], 1024  }
 0x2b2   :  { %993 = vsyncadd [#allocation4], 4294966272 }
 0x2b3   :  { %994 = dma.done.wait [#allocation7], 1536  }
 0x2b4   :  { %995 = vsyncadd [#allocation7], 4294965760 }
 0x2b5   :  { %845 = vsyncpa [#allocation3], 1 }
 0x2b6   :  { %846 = vsyncpa [#allocation4], 1 }
 0x2b7   :  { %847 = vsyncpa [#allocation7], 1 }

</bundles_post_ra>
